<compile_context>
chip_gen: v5e
topology: v5e:2x2
jax: 0.10.0
libtpu: 0.0.40
codegen_flags: <defaults>
</compile_context>

<pallas_src>
import jax
import jax.numpy as jnp
from jax.experimental import pallas as pl
from jax.experimental.pallas import tpu as pltpu


def _std_spline_kernel(sigma_ref, w_ref, a_ref, q_ref, o_ref):
    """One tile of: base(q) * softplus(piecewise-linear-interp(q)).

    sigma_ref : (1,)              SMEM scalar (prefetch)
    w_ref     : (Bt, 2*nseg)      [slope | x_lo], VMEM
    a_ref     : (2*nseg, St)      [P*(q - t_lo) ; P], VMEM
    q_ref     : (1, St)           query times, VMEM
    o_ref     : (Bt, St)          output, VMEM
    """
    # Segment gather + linear interpolation on the MXU (K = 2*(T-1) is tiny).
    y = jnp.dot(
        w_ref[...], a_ref[...],
        preferred_element_type=jnp.float32,
        precision=jax.lax.Precision.HIGHEST,
    )

    # Stable softplus; exp / log1p run on the otherwise-idle EUP slot.
    sp = jnp.maximum(y, 0.0) + jnp.log1p(jnp.exp(-jnp.abs(y)))

    # base = sigma * sqrt(t * (1 - t))  (one (1, St) row, broadcast over Bt).
    q = q_ref[...]
    base = sigma_ref[0] * jnp.sqrt(q * (1.0 - q))

    o_ref[...] = (base * sp).astype(o_ref.dtype)


def _round_up(x, m):
    return ((x + m - 1) // m) * m


def _choose_tiles(B, S):
    """Lane-dense S tiles (<=2048), sublane-aligned B tiles (<=256)."""
    s_tile = min(2048, _round_up(S, 128))
    b_tile = min(256, _round_up(B, 8))
    # Guarantee >=2 grid blocks when possible so v7x's two TensorCores both
    # get work (harmless ~0.35us extra grid step on single-core chips).
    if pl.cdiv(B, b_tile) * pl.cdiv(S, s_tile) < 2:
        if S > 128 and s_tile >= 256:
            s_tile = _round_up(pl.cdiv(S, 2), 128)
        elif B > 8 and b_tile >= 16:
            b_tile = _round_up(pl.cdiv(B, 2), 8)
    return b_tile, s_tile


def std_spline_forward(t_knots, xt_full, sigma, query_t):
    """
    t_knots : (T,)      knot times (strictly increasing)
    xt_full : (B, T, 1) knot values (x0 | knots | x1), D == 1
    sigma   : scalar
    query_t : (S,)      query times
    returns : (B, S, 1)
    """
    B, T, D = xt_full.shape
    assert D == 1 and T > 2
    (S,) = query_t.shape
    nseg = T - 1

    x_bt = xt_full[:, :, 0].astype(jnp.float32)            # (B, T)
    tk = t_knots.astype(jnp.float32)                       # (T,)
    q = query_t.astype(jnp.float32)                        # (S,)

    # W = [slope | x_lo]  so  y = slope*(q - t_lo) + x_lo  (reference form,
    # no slope*t cancellation).
    lo, hi = tk[:-1], tk[1:]                               # (nseg,)
    slope = (x_bt[:, 1:] - x_bt[:, :-1]) / (hi - lo)[None, :]   # (B, nseg)
    x_lo = x_bt[:, :-1]                                    # (B, nseg)
    w = jnp.concatenate([slope, x_lo], axis=1)             # (B, 2*nseg)

    # One-hot segment partition (clamped at both ends), matching
    # idx = clamp(#{j: t_j <= q} - 1, 0, T-2) of the reference interp.
    ge = q[None, :] >= lo[:, None]                         # (nseg, S)
    lt = q[None, :] < hi[:, None]                          # (nseg, S)
    ge = ge.at[0, :].set(True)                             # clamp below
    lt = lt.at[-1, :].set(True)                            # clamp above
    p = (ge & lt).astype(jnp.float32)                      # exactly one 1/col
    a = jnp.concatenate([p * (q[None, :] - lo[:, None]), p], axis=0)  # (2*nseg, S)

    q2d = q.reshape(1, S)
    sigma_arr = jnp.asarray(sigma, dtype=jnp.float32).reshape(1)

    b_tile, s_tile = _choose_tiles(B, S)
    grid = (pl.cdiv(B, b_tile), pl.cdiv(S, s_tile))        # si = inner axis

    cost = pl.CostEstimate(
        flops=int(B) * int(S) * (4 * nseg + 8),
        transcendentals=3 * int(B) * int(S),
        bytes_accessed=4 * (int(B) * int(S) + int(B) * 2 * nseg
                            + 2 * nseg * int(S) + int(S)),
    )

    grid_spec = pltpu.PrefetchScalarGridSpec(
        num_scalar_prefetch=1,                             # sigma -> SMEM
        grid=grid,
        in_specs=[
            # W: depends only on bi; si is innermost so it is NOT re-DMA'd
            # every step.  Last dim == full array dim (2*nseg) -> layout OK.
            pl.BlockSpec((b_tile, 2 * nseg), lambda bi, si, *_: (bi, 0)),
            # A: selection matrix, depends only on si.
            pl.BlockSpec((2 * nseg, s_tile), lambda bi, si, *_: (0, si)),
            # q row for base(t).
            pl.BlockSpec((1, s_tile), lambda bi, si, *_: (0, si)),
        ],
        out_specs=pl.BlockSpec((b_tile, s_tile), lambda bi, si, *_: (bi, si)),
    )

    out = pl.pallas_call(
        _std_spline_kernel,
        out_shape=jax.ShapeDtypeStruct((B, S), jnp.float32),
        grid_spec=grid_spec,
        compiler_params=pltpu.CompilerParams(
            dimension_semantics=("parallel", "parallel")),
        cost_estimate=cost,
    )(sigma_arr, w, a, q2d)

    return out.reshape(B, S, 1)


def std_spline_reference(t_knots, xt_full, sigma, query_t):
    """Pure-JAX reference (queries lie inside [t_0, t_{T-1}])."""
    B = xt_full.shape[0]
    interp = jnp.stack(
        [jnp.interp(query_t, t_knots, xt_full[b, :, 0]) for b in range(B)], axis=0
    )                                                      # (B, S)
    base = sigma * jnp.sqrt(query_t * (1.0 - query_t))     # (S,)
    return base[None, :, None] * jax.nn.softplus(interp)[:, :, None]


if __name__ == "__main__":
    key = jax.random.PRNGKey(0)
    sigma = 0.7

    # ---- case 1: tiny ragged shapes (single-block grid, OOB-dropped writes)
    B, T, S = 4, 8, 16
    t_knots = jnp.linspace(0.0, 1.0, T)
    k_x, k_q, key = jax.random.split(key, 3)
    xt = jax.random.normal(k_x, (B, T, 1), dtype=jnp.float32)
    xt_full = jnp.concatenate([xt[:, :1], xt[:, 1:-1], xt[:, -1:]], axis=1)
    query_t = jnp.sort(jax.random.uniform(k_q, (S,), minval=0.02, maxval=0.98))

    out = jax.block_until_ready(std_spline_forward(t_knots, xt_full, sigma, query_t))
    ref = std_spline_reference(t_knots, xt_full, sigma, query_t)
    assert out.shape == (B, S, 1), out.shape
    assert jnp.allclose(out, ref, atol=1e-5, rtol=1e-5), float(
        jnp.max(jnp.abs(out - ref)))

    # ---- case 2: aligned shapes exercising a multi-block grid (2 blocks in S)
    B2, T2, S2 = 16, 8, 256
    t_knots2 = jnp.linspace(0.0, 1.0, T2)
    k_x2, k_q2, key = jax.random.split(key, 3)
    xt2 = jax.random.normal(k_x2, (B2, T2, 1), dtype=jnp.float32)
    xt_full2 = jnp.concatenate([xt2[:, :1], xt2[:, 1:-1], xt2[:, -1:]], axis=1)
    query_t2 = jnp.sort(jax.random.uniform(k_q2, (S2,), minval=0.02, maxval=0.98))

    out2 = jax.block_until_ready(
        std_spline_forward(t_knots2, xt_full2, sigma, query_t2))
    ref2 = std_spline_reference(t_knots2, xt_full2, sigma, query_t2)
    assert out2.shape == (B2, S2, 1), out2.shape
    assert jnp.allclose(out2, ref2, atol=1e-5, rtol=1e-5), float(
        jnp.max(jnp.abs(out2 - ref2)))

    print("KERNEL_OK")
</pallas_src>

<mosaic_0001>
module attributes {stable_mosaic.version = 11 : i64} {
  func.func @_std_spline_kernel(%arg0: i32, %arg1: i32, %arg2: memref<1xf32, #tpu.memory_space<smem>>, %arg3: memref<8x14xf32, #tpu.memory_space<vmem>>, %arg4: memref<14x128xf32, #tpu.memory_space<vmem>>, %arg5: memref<1x128xf32, #tpu.memory_space<vmem>>, %arg6: memref<8x128xf32, #tpu.memory_space<vmem>>) attributes {dimension_semantics = [#tpu.dimension_semantics<parallel>, #tpu.dimension_semantics<parallel>], iteration_bounds = array<i64: 1, 1>, scalar_prefetch = 1 : i64, scratch_operands = 0 : i64, tpu.core_type = #tpu.core_type<tc>, window_params = [{transform_indices = @transform_0, window_bounds = array<i64: 8, 14>}, {transform_indices = @transform_1, window_bounds = array<i64: 14, 128>}, {transform_indices = @transform_2, window_bounds = array<i64: 1, 128>}, {transform_indices = @transform_3, window_bounds = array<i64: 8, 128>}]} {
    %c0 = arith.constant 0 : index
    %c0_0 = arith.constant 0 : index
    %0 = vector.load %arg3[%c0, %c0_0] : memref<8x14xf32, #tpu.memory_space<vmem>>, vector<8x14xf32>
    %c0_1 = arith.constant 0 : index
    %c0_2 = arith.constant 0 : index
    %1 = vector.load %arg4[%c0_1, %c0_2] : memref<14x128xf32, #tpu.memory_space<vmem>>, vector<14x128xf32>
    %cst = arith.constant dense<0.000000e+00> : vector<8x128xf32>
    %2 = tpu.matmul %0, %1, %cst {dimension_numbers = #tpu.dot_dimension_numbers<[1], [0], [0], [1], [0, 0, 1, 1], [], []>, precision = #tpu.contract_precision<fp32>} : vector<8x14xf32>, vector<14x128xf32>, vector<8x128xf32> -> vector<8x128xf32>
    %cst_3 = arith.constant 0.000000e+00 : f32
    %3 = vector.broadcast %cst_3 : f32 to vector<8x128xf32>
    %4 = arith.maximumf %2, %3 : vector<8x128xf32>
    %5 = math.absf %2 : vector<8x128xf32>
    %cst_4 = arith.constant 0.000000e+00 : f32
    %6 = vector.broadcast %cst_4 : f32 to vector<8x128xf32>
    %7 = arith.subf %6, %5 : vector<8x128xf32>
    %8 = math.exp %7 : vector<8x128xf32>
    %9 = math.log1p %8 : vector<8x128xf32>
    %10 = arith.addf %4, %9 : vector<8x128xf32>
    %c0_5 = arith.constant 0 : index
    %c0_6 = arith.constant 0 : index
    %11 = vector.load %arg5[%c0_5, %c0_6] : memref<1x128xf32, #tpu.memory_space<vmem>>, vector<1x128xf32>
    %c0_7 = arith.constant 0 : index
    %12 = memref.load %arg2[%c0_7] : memref<1xf32, #tpu.memory_space<smem>>
    %cst_8 = arith.constant 1.000000e+00 : f32
    %13 = vector.broadcast %cst_8 : f32 to vector<1x128xf32>
    %14 = arith.subf %13, %11 : vector<1x128xf32>
    %15 = arith.mulf %11, %14 : vector<1x128xf32>
    %16 = math.sqrt %15 : vector<1x128xf32>
    %17 = vector.broadcast %12 : f32 to vector<1x128xf32>
    %18 = arith.mulf %17, %16 : vector<1x128xf32>
    %19 = vector.broadcast %18 : vector<1x128xf32> to vector<8x128xf32>
    %20 = arith.mulf %19, %10 : vector<8x128xf32>
    %c0_9 = arith.constant 0 : index
    %c0_10 = arith.constant 0 : index
    %21 = vector.load %arg6[%c0_9, %c0_10] : memref<8x128xf32, #tpu.memory_space<vmem>>, vector<8x128xf32>
    tpu.vector_store %arg6[%c0_9, %c0_10], %20 {strides = array<i32>} : memref<8x128xf32, #tpu.memory_space<vmem>>, vector<8x128xf32>,
    return
  }
  func.func @transform_0(%arg0: i32, %arg1: i32, %arg2: memref<1xf32, #tpu.memory_space<smem>>) -> (i32, i32) {
    %c0_i32 = arith.constant 0 : i32
    %c0_i32_0 = arith.constant 0 : i32
    return %arg0, %c0_i32 : i32, i32
  }
  func.func @transform_1(%arg0: i32, %arg1: i32, %arg2: memref<1xf32, #tpu.memory_space<smem>>) -> (i32, i32) {
    %c0_i32 = arith.constant 0 : i32
    %c0_i32_0 = arith.constant 0 : i32
    return %c0_i32, %arg1 : i32, i32
  }
  func.func @transform_2(%arg0: i32, %arg1: i32, %arg2: memref<1xf32, #tpu.memory_space<smem>>) -> (i32, i32) {
    %c0_i32 = arith.constant 0 : i32
    %c0_i32_0 = arith.constant 0 : i32
    return %c0_i32, %arg1 : i32, i32
  }
  func.func @transform_3(%arg0: i32, %arg1: i32, %arg2: memref<1xf32, #tpu.memory_space<smem>>) -> (i32, i32) {
    %c0_i32 = arith.constant 0 : i32
    return %arg0, %arg1 : i32, i32
  }
}

</mosaic_0001>

<bundles_post_ra>
// kernel: tpu_custom_call.1
= control target key start
LH: loop header
LB: loop body
LE: loop exit
PB: predicated region body
PF: predicated region fallthrough
CT: control target
= control target key end

     0   :  { %10 = vsyncpa [#allocation5], 0  ;;  %s421_s0 = inlined_call_operand.<no memory space> [shape: f32[1], index: 0, kind: input, shape index: {}]   ;;  %s422_s1 = inlined_call_operand.hbm [shape: f32[4,14], index: 1, kind: input, shape index: {}]   ;;  %s423_s2 = inlined_call_operand.hbm [shape: f32[14,16], index: 2, kind: input, shape index: {}]   ;;  %s424_s3 = inlined_call_operand.vmem [shape: f32[1,16], index: 3, kind: input, shape index: {}]   ;;  %s425_s4 = inlined_call_operand.hbm [shape: f32[4,16], index: 4, kind: output, shape index: {}]  }
   0x1   :  { %11 = vsyncpa [#allocation8], 0 }
   0x2   :  { %12 = vsyncpa [#allocation6], 0 }
   0x3   :  { %16 = vsyncadd [#allocation5], 64  ;;  %s17_s17 = sshll.u32 %s422_s1, 4  ;;  %s368_s18 = smov [#allocation4]   ;;  %s18_s17 = int_to_ptr.hbm [resolvable:$true] %s17_s17 }
   0x4   :  { %s19_s19 = sshll.u32 %s368_s18, 4  ;;  %s30_s22 = sshll.u32 %s423_s2, 4  ;;  %s20_s19 = int_to_ptr.vmem [resolvable:$true] %s19_s19  ;;  %s31_s22 = int_to_ptr.hbm [resolvable:$true] %s30_s22 }
   0x5   :  { %s369_s23 = smov 64   ;;  %s370_s24 = smov 4  }
   0x6   :  { %25 = dma.hbm_to_vmem [thread:$0]  %s18_s17, 64, %s20_s19, [#allocation5], %s369_s23, %s369_s23, %s370_s24  }
   0x7   :  { %s371_s25 = smov [#allocation7]   ;;  %s372_s27 = smov 128  }
   0x8   :  { %s32_s26 = sshll.u32 %s371_s25, 4  ;;  %s373_s1 = smov 8   ;;  %s33_s26 = int_to_ptr.vmem [resolvable:$true] %s32_s26 }
   0x9   :  { %38 = dma.hbm_to_vmem [thread:$0]  %s31_s22, 256, %s33_s26, [#allocation8], %s372_s27, %s372_s27, %s373_s1  }
   0xa   :  { %362 = dma.done.wait [#allocation5], 128  }
   0xb   :  { %363 = vsyncadd [#allocation5], 4294967168 }
   0xc   :  { %364 = dma.done.wait [#allocation8], 256  }
   0xd   :  { %365 = vsyncadd [#allocation8], 4294967040  ;;  %vm56_vm0 = vcmask 1045504   ;;  %vm52_vm1 = vcmask 113664   ;;  %v51_v0 = vld [vmem:[#allocation7 + $0x8] sm:$0x3f]  ;;  %v250_v50 = vstv %s421_s0 }
   0xe   :  { %v50_v1 = vld [vmem:[#allocation7] sm:$0xff]  ;;  %v49_v2 = vld [vmem:[#allocation4] sm:$0xff]  ;;  %v58_v3 = vsel %vm56_vm0, %v51_v0, 0 }
   0xf   :  { %v76_v4 = vand.u32 4294901760, %v50_v1  ;;  %v54_v5 = vsel %vm52_vm1, %v49_v2, 0  ;;  %v74_v6 = vand.u32 4294901760, %v58_v3  ;;  %v234_v20 = vld [vmem:[%s424_s3] sm:$0x1] }
  0x10   :  { %v78_v7 = vand.u32 4294901760, %v54_v5  ;;  %v236_v21 = vsub.f32 1.0, %v234_v20 }
  0x11   :  { %v108_v8 = vsub.f32 %v50_v1, %v76_v4  ;;  %v102_v9 = vsub.f32 %v58_v3, %v74_v6  ;;  %75 = vmatpush.msra.mxu0 %v74_v6  ;;  %159 = vmatpush.msra.mxu3 %v74_v6 }
  0x12   :  { %v79_v10 = vsub.f32 %v54_v5, %v78_v7  ;;  %v237_v22 = vmul.f32 %v236_v21, %v234_v20 }
  0x13   :  { %v109_v11 = vand.u32 4294901760, %v108_v8  ;;  %134 = vmatpush.msra.mxu2 %v102_v9  ;;  %77 = vmatpush.msra.mxu0 %v76_v4  ;;  %v103_v12 = vand.u32 4294901760, %v102_v9 }
  0x14   :  { %v80_v13 = vand.u32 4294901760, %v79_v10  ;;  %161 = vmatpush.msra.mxu3 %v76_v4  ;;  %284 = vrsqrt.f32 %v237_v22  ;;  %vm245_vm2 = vcmp.eq.f32.partialorder %v237_v22, inf  ;;  %v248_v45 = vand.u32 2147483648, %v237_v22 }
  0x15   :  { %v110_v14 = vsub.f32 %v108_v8, %v109_v11  ;;  %137 = vmatpush.msra.mxu2 %v108_v8  ;;  %v104_v15 = vsub.f32 %v102_v9, %v103_v12  ;;  %186 = vmatpush.msrb.mxu0 %v103_v12  ;;  %vm247_vm3 = vcmp.eq.f32.partialorder %v237_v22, 0.0 }
  0x16   :  { %v81_v16 = vsub.f32 %v79_v10, %v80_v13  ;;  %165 = vmatmul.f32.vlgmr.msra.gmra.mxu3 %v80_v13  ;;  %140 = vmatmul.f32.vlgmr.msra.gmra.mxu2 %v79_v10 }
  0x17   :  { %v105_v17 = vand.u32 4294901760, %v104_v15  ;;  %v111_v19 = vand.u32 4294901760, %v110_v14  ;;  %190 = vmatpush.msrb.mxu0 %v109_v11 }
  0x18   :  { %v82_v18 = vand.u32 4294901760, %v81_v16 }
  0x19   :  { %106 = vmatpush.msra.mxu1 %v105_v17 }
  0x1a   :  { %83 = vmatmul.f32.vlgmr.msra.gmra.mxu0 %v82_v18  ;;  %v285_v23 = vpop.eup %284 }
  0x1b   :  { %112 = vmatpush.msra.mxu1 %v111_v19  ;;  %v239_v27 = vmul.f32 %v285_v23, %v237_v22 }
  0x1c   :  { %114 = vmatmul.f32.vlgmr.msra.gmra.mxu1 %v78_v7 }
  0x1d   :  { %211 = vmatpush.msrb.mxu1 %v74_v6  ;;  %v240_v31 = vmul.f32 %v285_v23, %v239_v27 }
  0x1f   :  { %213 = vmatpush.msrb.mxu1 %v76_v4  ;;  %v241_v36 = vmul.f32 0.5, %v240_v31 }
  0x21   :  { %v242_v39 = vsub.f32 1.5, %v241_v36 }
  0x22   :  { %192 = vmatmul.f32.vlgmr.msrb.gmra.mxu0 %v78_v7 }
  0x23   :  { %v243_v42 = vmul.f32 %v285_v23, %v242_v39 }
  0x24   :  { %215 = vmatmul.f32.vlgmr.msrb.gmra.mxu1 %v78_v7 }
  0x25   :  { %v244_v43 = vmul.f32 %v243_v42, %v237_v22 }
  0x27   :  { %v246_v47 = vsel %vm245_vm2, %v237_v22, %v244_v43 }
  0x28   :  { %v249_v49 = vsel %vm247_vm3, %v248_v45, %v246_v47 }
  0x29   :  { %v251_v53 = vmul.f32 %v250_v50, %v249_v49 }
  0x2b   :  { %v253_v58 = vperm.slane %v251_v53, 0 }
  0x97   :  { %v84_v24 = vpop.f32.mrf.mxu0 }
  0x99   :  { %v115_v25 = vpop.f32.mrf.mxu1  ;;  %v141_v26 = vpop.f32.mrf.mxu2 }
  0x9a   :  { %v116_v28 = vadd.f32 %v115_v25, %v84_v24  ;;  %v166_v29 = vpop.f32.mrf.mxu3 }
  0x9c   :  { %v142_v30 = vadd.f32 %v141_v26, %v116_v28 }
  0x9e   :  { %v167_v32 = vadd.f32 %v166_v29, %v142_v30 }
  0x9f   :  { %v193_v33 = vpop.f32.mrf.mxu0 }
  0xa0   :  { %v194_v34 = vadd.f32 %v193_v33, %v167_v32 }
  0xa1   :  { %v216_v35 = vpop.f32.mrf.mxu1 }
  0xa2   :  { %v217_v37 = vadd.f32 %v216_v35, %v194_v34 }
  0xa4   :  { %v220_v38 = vand.u32 2147483647, %v217_v37  ;;  %v219_v57 = vmax.f32 %v217_v37, 0.0 }
  0xa6   :  { %v221_v40 = vsub.f32 0.0, %v220_v38 }
  0xa8   :  { %v222_v41 = vmul.f32 1.442695, %v221_v40 }
  0xaa   :  { %286 = vpow2.f32 %v222_v41 }
  0xb0   :  { %v287_v44 = vpop.eup %286 }
  0xb1   :  { %v224_v46 = vadd.f32 1.0, %v287_v44  ;;  %v227_v48 = vmul.f32 -0.5, %v287_v44  ;;  %v230_v52 = vand.u32 2147483647, %v287_v44 }
  0xb3   :  { %288 = vlog2.f32 %v224_v46  ;;  %v228_v51 = vadd.f32 1.0, %v227_v48  ;;  %vm231_vm4 = vcmp.lt.f32.partialorder %v230_v52, 0.0004427343 }
  0xb5   :  { %v229_v56 = vmul.f32 %v287_v44, %v228_v51 }
  0xb9   :  { %v289_v54 = vpop.eup %288 }
  0xba   :  { %v226_v55 = vmul.f32 0.6931472, %v289_v54 }
  0xbc   :  { %v232_v59 = vsel %vm231_vm4, %v229_v56, %v226_v55 }
  0xbd   :  { %v233_v60 = vadd.f32 %v232_v59, %v219_v57 }
  0xbf   :  { %v255_v61 = vmul.f32 %v253_v58, %v233_v60 }
  0xc1   :  { %256 = vst [vmem:[#allocation9] sm:$0xff] %v255_v61 }
  0xc2   :  { %260 = vsyncadd [#allocation6], 64  ;;  %s263_s6 = sshll.u32 %s425_s4, 4  ;;  %s374_s7 = smov [#allocation9]   ;;  %s264_s6 = int_to_ptr.hbm [resolvable:$true] %s263_s6 }
  0xc3   :  { %s261_s0 = sshll.u32 %s374_s7, 4  ;;  %s262_s0 = int_to_ptr.vmem [resolvable:$true] %s261_s0 }
  0xc4   :  { %269 = dma.vmem_to_hbm [thread:$0]  %s262_s0, 64, %s264_s6, [#allocation6], %s369_s23, %s369_s23, %s370_s24  }
  0xc5   :  { %366 = dma.done.wait [#allocation6], 128  }
  0xc6   :  { %367 = vsyncadd [#allocation6], 4294967168 }
  0xc7   :  { %274 = vsyncpa [#allocation5], 1 }
  0xc8   :  { %275 = vsyncpa [#allocation8], 1 }
  0xc9   :  { %276 = vsyncpa [#allocation6], 1 }

</bundles_post_ra>
